<compile_context>
chip_gen: v5e
topology: v5e:2x2
jax: 0.10.0
libtpu: 0.0.40
codegen_flags: <defaults>
</compile_context>

<pallas_src>
import functools
import math

import jax
import jax.numpy as jnp
import numpy as np
from jax.experimental import pallas as pl
from jax.experimental.pallas import tpu as pltpu


# ----------------------------------------------------------------------------
# helpers mirroring the PyTorch module's bookkeeping
# ----------------------------------------------------------------------------
def _split_channels(channels, num_groups):
    split = [channels // num_groups for _ in range(num_groups)]
    split[0] += channels - sum(split)
    return split


def _round_up(a, b):
    return (a + b - 1) // b * b


def _cdiv(a, b):
    return -(-a // b)


def _sublane_multiple(dtype):
    # packed sublane tile rows: f32 -> 8, bf16/f16 -> 16, int8/fp8 -> 32
    return 8 * (4 // jnp.dtype(dtype).itemsize)


# ----------------------------------------------------------------------------
# Pallas kernel: one (image, lane-block) per grid step
# ----------------------------------------------------------------------------
def _conv2d_kernel(x_ref, w_ref, o_ref, col_ref, *, kh, kw, wp, bp):
    # x_ref:   (1, nb_in, Cin_p, BP) padded flat image, chunked into BP-lane slabs
    # w_ref:   (Cout, KH*KW*Cin_p)   im2col-flattened weight (tap-major, ch-minor)
    # o_ref:   (1, Cout, BP)         lane-dense output block (BP % 128 == 0)
    # col_ref: (KH*KW*Cin_p, BP)     VMEM im2col scratch for this block
    cin_p = x_ref.shape[2]
    r = pl.program_id(1)          # which BP-lane output block of this image

    # im2col: tap (i, j) of block r is the flat padded image shifted by the
    # static offset i*wp + j, read out of (at most two) BP-lane chunks with
    # static lane slices; only the chunk index is dynamic (untiled leading dim).
    for i in range(kh):
        for j in range(kw):
            s = i * kw + j
            pos = i * wp + j
            dst = 0
            while dst < bp:                       # static trace-time loop
                c, off = divmod(pos + dst, bp)
                take = min(bp - off, bp - dst)
                col_ref[s * cin_p:(s + 1) * cin_p, dst:dst + take] = (
                    x_ref[0, r + c, :, off:off + take])
                dst += take

    # One fat contraction on the MXU, f32 accumulation; acc is (Cout, BP):
    # big spatial extent on the 128-wide lane axis, small Cout on sublanes.
    acc = jnp.dot(w_ref[...], col_ref[...], preferred_element_type=jnp.float32)
    o_ref[0] = acc.astype(o_ref.dtype)


def _conv2d_pallas(x_nchw, cw, mxu_dtype, stride, padding, *, target_bp=2048):
    """Single (no-bias) 2D convolution via one Pallas launch. NCHW input."""
    n, cin, h, w = map(int, x_nchw.shape)
    assert cin == cw["cin"], (cin, cw["cin"])
    cin_p, cout, kh, kw = cw["cin_p"], cw["cout"], cw["kh"], cw["kw"]
    out_dtype = x_nchw.dtype
    itb = jnp.dtype(mxu_dtype).itemsize

    hp, wp = h + 2 * padding, w + 2 * padding
    ho = (hp - kh) // stride + 1
    wo = (wp - kw) // stride + 1
    assert ho > 0 and wo > 0

    # flat (row-major, padded-width) output lane extent the kernel computes
    p_rows = (ho - 1) * stride + 1
    p = p_rows * wp

    # lane-block size: multiple of 128 (lane-dense stores), sized so the
    # KH*KW-amplified col scratch stays around <= 2 MiB.
    kdim = kh * kw * cin_p
    budget_bp = max(128, ((2 << 20) // (kdim * itb)) // 128 * 128)
    tbp = min(target_bp, budget_bp)
    nb = _cdiv(p, tbp)
    bp = _round_up(_cdiv(p, nb), 128)
    p_pad = nb * bp

    # input chunks: enough BP-lane slabs that every tap slice of every block
    # stays in bounds (KH-1 row / KW-1 col halo -> at most one extra chunk).
    max_d = (kh - 1) * wp + (kw - 1)
    nb_in = max(nb + (max_d + bp - 1) // bp, _cdiv(hp * wp, bp))
    flat_len = nb_in * bp

    # One wrapper-side layout/cast pass: cast to MXU operand dtype, channel-pad
    # to the packed-sublane multiple, zero-pad spatially, flatten, chunk the
    # flat spatial axis into BP-lane slabs (chunk-major).
    xp = jnp.pad(x_nchw.astype(mxu_dtype),
                 ((0, 0), (0, cin_p - cin),
                  (padding, padding), (padding, padding)))
    xf = jnp.pad(xp.reshape(n, cin_p, hp * wp),
                 ((0, 0), (0, 0), (0, flat_len - hp * wp)))
    x_chunks = jnp.transpose(xf.reshape(n, cin_p, nb_in, bp), (0, 2, 1, 3))

    # explicit VMEM budget (double-buffered blocks + scratch) -> scoped limit
    out_itb = jnp.dtype(out_dtype).itemsize
    vmem_bytes = (2 * nb_in * cin_p * bp * itb      # input slab (chunked)
                  + 2 * cout * kdim * itb           # weight
                  + 2 * cout * bp * out_itb         # output block
                  + kdim * bp * itb                 # col scratch
                  + cout * bp * 4)                  # f32 accumulator
    vmem_limit = int(min(max(vmem_bytes * 5 // 4 + (2 << 20), 32 << 20),
                         100 << 20))

    kernel = functools.partial(_conv2d_kernel, kh=kh, kw=kw, wp=wp, bp=bp)

    y = pl.pallas_call(
        kernel,
        out_shape=jax.ShapeDtypeStruct((n, cout, p_pad), out_dtype),
        grid=(n, nb),
        in_specs=[pl.BlockSpec((1, nb_in, cin_p, bp), lambda b, r: (b, 0, 0, 0)),
                  pl.BlockSpec((cout, kdim), lambda b, r: (0, 0))],
        out_specs=pl.BlockSpec((1, cout, bp), lambda b, r: (b, 0, r)),
        scratch_shapes=[pltpu.VMEM((kdim, bp), mxu_dtype)],
        compiler_params=pltpu.CompilerParams(
            dimension_semantics=("parallel", "parallel"),
            vmem_limit_bytes=vmem_limit),
    )(x_chunks, cw["w_flat"])

    # crop the padded-width / stride columns (cheap XLA slice) -> NCHW
    y = y[:, :, :p].reshape(n, cout, p_rows, wp)
    y = y[:, :, ::stride, :(wo - 1) * stride + 1:stride]
    return y                                   # (N, Cout, Ho, Wo)


# ----------------------------------------------------------------------------
# GroupedConv2d: init / prepare (once) / forward (matches PyTorch semantics)
# ----------------------------------------------------------------------------
def init_grouped_conv2d(key, in_channels, out_channels, kernel_size):
    """Deterministic weights mimicking nn.Conv2d default init (bias=False)."""
    num_groups = len(kernel_size)
    split_in = _split_channels(in_channels, num_groups)
    split_out = _split_channels(out_channels, num_groups)
    weights = []
    keys = jax.random.split(key, num_groups)
    for g in range(num_groups):
        k = int(kernel_size[g])
        fan_in = split_in[g] * k * k
        bound = 1.0 / math.sqrt(fan_in)
        weights.append(jax.random.uniform(
            keys[g], (split_out[g], split_in[g], k, k),
            minval=-bound, maxval=bound, dtype=jnp.float32))
    return weights, split_in, split_out


def _prep_conv_weight(w_oihw, mxu_dtype):
    cout, cin, kh, kw = map(int, w_oihw.shape)
    cin_p = _round_up(cin, _sublane_multiple(mxu_dtype))
    w_pad = jnp.pad(w_oihw, ((0, 0), (0, cin_p - cin), (0, 0), (0, 0)))
    w_flat = jnp.transpose(w_pad, (0, 2, 3, 1)).reshape(cout, kh * kw * cin_p)
    return dict(w_flat=w_flat.astype(mxu_dtype),
                cin=cin, cin_p=cin_p, cout=cout, kh=kh, kw=kw)


def prepare_grouped_conv2d(weights, kernel_size, in_channels,
                           mxu_dtype=jnp.float32):
    """Precompute (at init time, not per forward) fused / per-group weights.

    Set mxu_dtype=jnp.bfloat16 on v6e/v7x for full MXU throughput (f32 accum)."""
    num_groups = len(kernel_size)
    split_in = _split_channels(in_channels, num_groups)
    homogeneous = all(int(k) == int(kernel_size[0]) for k in kernel_size)
    if homogeneous:
        # Fuse every group into ONE launch via a block-diagonal OIHW weight
        # (exact: off-diagonal zeros contribute nothing).
        k = int(kernel_size[0])
        cout = sum(int(wg.shape[0]) for wg in weights)
        wbd = jnp.zeros((cout, in_channels, k, k), weights[0].dtype)
        ro = co = 0
        for wg, cin_g in zip(weights, split_in):
            og = int(wg.shape[0])
            wbd = wbd.at[ro:ro + og, co:co + cin_g].set(wg)
            ro += og
            co += cin_g
        convs = [_prep_conv_weight(wbd, mxu_dtype)]
    else:
        convs = [_prep_conv_weight(wg, mxu_dtype) for wg in weights]
    return dict(fused=homogeneous, mxu_dtype=mxu_dtype, split_in=split_in,
                convs=convs)


def grouped_conv2d_forward(x_nchw, plan, stride=1, padding=0):
    """Forward pass matching the PyTorch GroupedConv2d module (bias=False)."""
    if plan["fused"]:
        return _conv2d_pallas(x_nchw, plan["convs"][0], plan["mxu_dtype"],
                              stride, padding)
    # Heterogeneous kernel sizes: one launch per group. Like the PyTorch
    # module, the shared stride/padding must yield matching spatial dims.
    outs, start = [], 0
    for cw, cin_g in zip(plan["convs"], plan["split_in"]):
        xg = x_nchw[:, start:start + cin_g]
        start += cin_g
        outs.append(_conv2d_pallas(xg, cw, plan["mxu_dtype"], stride, padding))
    return jnp.concatenate(outs, axis=1)


# ----------------------------------------------------------------------------
# reference (pure JAX) for silent correctness checks
# ----------------------------------------------------------------------------
def _ref_grouped_conv2d(x_nchw, weights, kernel_size, stride, padding):
    num_groups = len(kernel_size)
    split_in = _split_channels(int(x_nchw.shape[1]), num_groups)
    outs, start = [], 0
    for g in range(num_groups):
        xg = x_nchw[:, start:start + split_in[g]]
        start += split_in[g]
        y = jax.lax.conv_general_dilated(
            xg, weights[g],
            window_strides=(stride, stride),
            padding=[(padding, padding), (padding, padding)],
            dimension_numbers=("NCHW", "OIHW", "NCHW"))
        outs.append(y)
    return jnp.concatenate(outs, axis=1)


if __name__ == "__main__":
    key = jax.random.PRNGKey(0)
    k_x, k_w = jax.random.split(key)

    # GroupedConv2d(in_channels=5, out_channels=6, kernel_size=[3, 3],
    #               stride=1, padding=1) -> split_in=[3, 2], split_out=[3, 3]
    in_channels, out_channels = 5, 6
    kernel_size = [3, 3]

    x = jax.random.normal(k_x, (2, in_channels, 16, 16), dtype=jnp.float32)
    weights, split_in, split_out = init_grouped_conv2d(
        k_w, in_channels, out_channels, kernel_size)
    y_ref = _ref_grouped_conv2d(x, weights, kernel_size, 1, 1)

    # ---- f32 MXU-operand path: exact-ish, checked at 1e-4 -----------------
    plan32 = prepare_grouped_conv2d(weights, kernel_size, in_channels,
                                    mxu_dtype=jnp.float32)
    fwd = jax.jit(lambda x_: grouped_conv2d_forward(x_, plan32,
                                                    stride=1, padding=1))
    y = jax.block_until_ready(fwd(x))
    assert y.shape == (2, out_channels, 16, 16), y.shape
    np.testing.assert_allclose(np.asarray(y), np.asarray(y_ref),
                               rtol=1e-4, atol=1e-4)

    # ---- stride-2 path (exercises the crop logic) -------------------------
    fwd_s2 = jax.jit(lambda x_: grouped_conv2d_forward(x_, plan32,
                                                       stride=2, padding=1))
    y2 = jax.block_until_ready(fwd_s2(x))
    y2_ref = _ref_grouped_conv2d(x, weights, kernel_size, 2, 1)
    assert y2.shape == y2_ref.shape, (y2.shape, y2_ref.shape)
    np.testing.assert_allclose(np.asarray(y2), np.asarray(y2_ref),
                               rtol=1e-4, atol=1e-4)

    # ---- bf16 MXU operands (recommended default on v6e/v7x), f32 accum ----
    plan16 = prepare_grouped_conv2d(weights, kernel_size, in_channels,
                                    mxu_dtype=jnp.bfloat16)
    fwd16 = jax.jit(lambda x_: grouped_conv2d_forward(x_, plan16,
                                                      stride=1, padding=1))
    y16 = jax.block_until_ready(fwd16(x))
    np.testing.assert_allclose(np.asarray(y16), np.asarray(y_ref),
                               rtol=5e-2, atol=5e-2)

    print("KERNEL_OK")
</pallas_src>

<mosaic_0001>
module attributes {stable_mosaic.version = 11 : i64} {
  func.func @_conv2d_kernel(%arg0: i32, %arg1: i32, %arg2: memref<1x2x8x384xf32, #tpu.memory_space<vmem>>, %arg3: memref<6x72xf32, #tpu.memory_space<vmem>>, %arg4: memref<1x6x384xf32, #tpu.memory_space<vmem>>, %arg5: memref<72x384xf32, #tpu.memory_space<vmem>>) attributes {dimension_semantics = [#tpu.dimension_semantics<parallel>, #tpu.dimension_semantics<parallel>], iteration_bounds = array<i64: 2, 1>, scalar_prefetch = 0 : i64, scratch_operands = 1 : i64, tpu.core_type = #tpu.core_type<tc>, window_params = [{transform_indices = @transform_0, window_bounds = array<i64: 1, 2, 8, 384>}, {pipeline_mode = #tpu.pipeline_mode<synchronous>, transform_indices = @transform_1, window_bounds = array<i64: 6, 72>}, {transform_indices = @transform_2, window_bounds = array<i64: 1, 6, 384>}]} {
    %c0_i32 = arith.constant 0 : i32
    %0 = arith.addi %arg1, %c0_i32 : i32
    %c0 = arith.constant 0 : index
    %1 = arith.index_cast %0 : i32 to index
    %c0_0 = arith.constant 0 : index
    %c0_1 = arith.constant 0 : index
    %2 = vector.load %arg2[%c0, %1, %c0_0, %c0_1] : memref<1x2x8x384xf32, #tpu.memory_space<vmem>>, vector<1x1x8x384xf32>
    %3 = vector.shape_cast %2 : vector<1x1x8x384xf32> to vector<8x384xf32>
    %c0_2 = arith.constant 0 : index
    %c0_3 = arith.constant 0 : index
    %4 = vector.load %arg5[%c0_2, %c0_3] : memref<72x384xf32, #tpu.memory_space<vmem>>, vector<8x384xf32>
    tpu.vector_store %arg5[%c0_2, %c0_3], %3 {strides = array<i32>} : memref<72x384xf32, #tpu.memory_space<vmem>>, vector<8x384xf32>,
    %c0_i32_4 = arith.constant 0 : i32
    %5 = arith.addi %arg1, %c0_i32_4 : i32
    %c0_5 = arith.constant 0 : index
    %6 = arith.index_cast %5 : i32 to index
    %c0_6 = arith.constant 0 : index
    %c1 = arith.constant 1 : index
    %7 = vector.load %arg2[%c0_5, %6, %c0_6, %c1] : memref<1x2x8x384xf32, #tpu.memory_space<vmem>>, vector<1x1x8x383xf32>
    %8 = vector.shape_cast %7 : vector<1x1x8x383xf32> to vector<8x383xf32>
    %c8 = arith.constant 8 : index
    %c0_7 = arith.constant 0 : index
    %9 = vector.load %arg5[%c8, %c0_7] : memref<72x384xf32, #tpu.memory_space<vmem>>, vector<8x383xf32>
    tpu.vector_store %arg5[%c8, %c0_7], %8 {strides = array<i32>} : memref<72x384xf32, #tpu.memory_space<vmem>>, vector<8x383xf32>,
    %c1_i32 = arith.constant 1 : i32
    %10 = arith.addi %arg1, %c1_i32 : i32
    %c0_8 = arith.constant 0 : index
    %11 = arith.index_cast %10 : i32 to index
    %c0_9 = arith.constant 0 : index
    %c0_10 = arith.constant 0 : index
    %12 = vector.load %arg2[%c0_8, %11, %c0_9, %c0_10] : memref<1x2x8x384xf32, #tpu.memory_space<vmem>>, vector<1x1x8x1xf32>
    %13 = vector.shape_cast %12 : vector<1x1x8x1xf32> to vector<8x1xf32>
    %c8_11 = arith.constant 8 : index
    %c383 = arith.constant 383 : index
    %14 = vector.load %arg5[%c8_11, %c383] : memref<72x384xf32, #tpu.memory_space<vmem>>, vector<8x1xf32>
    tpu.vector_store %arg5[%c8_11, %c383], %13 {strides = array<i32>} : memref<72x384xf32, #tpu.memory_space<vmem>>, vector<8x1xf32>,
    %c0_i32_12 = arith.constant 0 : i32
    %15 = arith.addi %arg1, %c0_i32_12 : i32
    %c0_13 = arith.constant 0 : index
    %16 = arith.index_cast %15 : i32 to index
    %c0_14 = arith.constant 0 : index
    %c2 = arith.constant 2 : index
    %17 = vector.load %arg2[%c0_13, %16, %c0_14, %c2] : memref<1x2x8x384xf32, #tpu.memory_space<vmem>>, vector<1x1x8x382xf32>
    %18 = vector.shape_cast %17 : vector<1x1x8x382xf32> to vector<8x382xf32>
    %c16 = arith.constant 16 : index
    %c0_15 = arith.constant 0 : index
    %19 = vector.load %arg5[%c16, %c0_15] : memref<72x384xf32, #tpu.memory_space<vmem>>, vector<8x382xf32>
    tpu.vector_store %arg5[%c16, %c0_15], %18 {strides = array<i32>} : memref<72x384xf32, #tpu.memory_space<vmem>>, vector<8x382xf32>,
    %c1_i32_16 = arith.constant 1 : i32
    %20 = arith.addi %arg1, %c1_i32_16 : i32
    %c0_17 = arith.constant 0 : index
    %21 = arith.index_cast %20 : i32 to index
    %c0_18 = arith.constant 0 : index
    %c0_19 = arith.constant 0 : index
    %22 = vector.load %arg2[%c0_17, %21, %c0_18, %c0_19] : memref<1x2x8x384xf32, #tpu.memory_space<vmem>>, vector<1x1x8x2xf32>
    %23 = vector.shape_cast %22 : vector<1x1x8x2xf32> to vector<8x2xf32>
    %c16_20 = arith.constant 16 : index
    %c382 = arith.constant 382 : index
    %24 = vector.load %arg5[%c16_20, %c382] : memref<72x384xf32, #tpu.memory_space<vmem>>, vector<8x2xf32>
    tpu.vector_store %arg5[%c16_20, %c382], %23 {strides = array<i32>} : memref<72x384xf32, #tpu.memory_space<vmem>>, vector<8x2xf32>,
    %c0_i32_21 = arith.constant 0 : i32
    %25 = arith.addi %arg1, %c0_i32_21 : i32
    %c0_22 = arith.constant 0 : index
    %26 = arith.index_cast %25 : i32 to index
    %c0_23 = arith.constant 0 : index
    %c18 = arith.constant 18 : index
    %27 = vector.load %arg2[%c0_22, %26, %c0_23, %c18] : memref<1x2x8x384xf32, #tpu.memory_space<vmem>>, vector<1x1x8x366xf32>
    %28 = vector.shape_cast %27 : vector<1x1x8x366xf32> to vector<8x366xf32>
    %c24 = arith.constant 24 : index
    %c0_24 = arith.constant 0 : index
    %29 = vector.load %arg5[%c24, %c0_24] : memref<72x384xf32, #tpu.memory_space<vmem>>, vector<8x366xf32>
    tpu.vector_store %arg5[%c24, %c0_24], %28 {strides = array<i32>} : memref<72x384xf32, #tpu.memory_space<vmem>>, vector<8x366xf32>,
    %c1_i32_25 = arith.constant 1 : i32
    %30 = arith.addi %arg1, %c1_i32_25 : i32
    %c0_26 = arith.constant 0 : index
    %31 = arith.index_cast %30 : i32 to index
    %c0_27 = arith.constant 0 : index
    %c0_28 = arith.constant 0 : index
    %32 = vector.load %arg2[%c0_26, %31, %c0_27, %c0_28] : memref<1x2x8x384xf32, #tpu.memory_space<vmem>>, vector<1x1x8x18xf32>
    %33 = vector.shape_cast %32 : vector<1x1x8x18xf32> to vector<8x18xf32>
    %c24_29 = arith.constant 24 : index
    %c366 = arith.constant 366 : index
    %34 = vector.load %arg5[%c24_29, %c366] : memref<72x384xf32, #tpu.memory_space<vmem>>, vector<8x18xf32>
    tpu.vector_store %arg5[%c24_29, %c366], %33 {strides = array<i32>} : memref<72x384xf32, #tpu.memory_space<vmem>>, vector<8x18xf32>,
    %c0_i32_30 = arith.constant 0 : i32
    %35 = arith.addi %arg1, %c0_i32_30 : i32
    %c0_31 = arith.constant 0 : index
    %36 = arith.index_cast %35 : i32 to index
    %c0_32 = arith.constant 0 : index
    %c19 = arith.constant 19 : index
    %37 = vector.load %arg2[%c0_31, %36, %c0_32, %c19] : memref<1x2x8x384xf32, #tpu.memory_space<vmem>>, vector<1x1x8x365xf32>
    %38 = vector.shape_cast %37 : vector<1x1x8x365xf32> to vector<8x365xf32>
    %c32 = arith.constant 32 : index
    %c0_33 = arith.constant 0 : index
    %39 = vector.load %arg5[%c32, %c0_33] : memref<72x384xf32, #tpu.memory_space<vmem>>, vector<8x365xf32>
    tpu.vector_store %arg5[%c32, %c0_33], %38 {strides = array<i32>} : memref<72x384xf32, #tpu.memory_space<vmem>>, vector<8x365xf32>,
    %c1_i32_34 = arith.constant 1 : i32
    %40 = arith.addi %arg1, %c1_i32_34 : i32
    %c0_35 = arith.constant 0 : index
    %41 = arith.index_cast %40 : i32 to index
    %c0_36 = arith.constant 0 : index
    %c0_37 = arith.constant 0 : index
    %42 = vector.load %arg2[%c0_35, %41, %c0_36, %c0_37] : memref<1x2x8x384xf32, #tpu.memory_space<vmem>>, vector<1x1x8x19xf32>
    %43 = vector.shape_cast %42 : vector<1x1x8x19xf32> to vector<8x19xf32>
    %c32_38 = arith.constant 32 : index
    %c365 = arith.constant 365 : index
    %44 = vector.load %arg5[%c32_38, %c365] : memref<72x384xf32, #tpu.memory_space<vmem>>, vector<8x19xf32>
    tpu.vector_store %arg5[%c32_38, %c365], %43 {strides = array<i32>} : memref<72x384xf32, #tpu.memory_space<vmem>>, vector<8x19xf32>,
    %c0_i32_39 = arith.constant 0 : i32
    %45 = arith.addi %arg1, %c0_i32_39 : i32
    %c0_40 = arith.constant 0 : index
    %46 = arith.index_cast %45 : i32 to index
    %c0_41 = arith.constant 0 : index
    %c20 = arith.constant 20 : index
    %47 = vector.load %arg2[%c0_40, %46, %c0_41, %c20] : memref<1x2x8x384xf32, #tpu.memory_space<vmem>>, vector<1x1x8x364xf32>
    %48 = vector.shape_cast %47 : vector<1x1x8x364xf32> to vector<8x364xf32>
    %c40 = arith.constant 40 : index
    %c0_42 = arith.constant 0 : index
    %49 = vector.load %arg5[%c40, %c0_42] : memref<72x384xf32, #tpu.memory_space<vmem>>, vector<8x364xf32>
    tpu.vector_store %arg5[%c40, %c0_42], %48 {strides = array<i32>} : memref<72x384xf32, #tpu.memory_space<vmem>>, vector<8x364xf32>,
    %c1_i32_43 = arith.constant 1 : i32
    %50 = arith.addi %arg1, %c1_i32_43 : i32
    %c0_44 = arith.constant 0 : index
    %51 = arith.index_cast %50 : i32 to index
    %c0_45 = arith.constant 0 : index
    %c0_46 = arith.constant 0 : index
    %52 = vector.load %arg2[%c0_44, %51, %c0_45, %c0_46] : memref<1x2x8x384xf32, #tpu.memory_space<vmem>>, vector<1x1x8x20xf32>
    %53 = vector.shape_cast %52 : vector<1x1x8x20xf32> to vector<8x20xf32>
    %c40_47 = arith.constant 40 : index
    %c364 = arith.constant 364 : index
    %54 = vector.load %arg5[%c40_47, %c364] : memref<72x384xf32, #tpu.memory_space<vmem>>, vector<8x20xf32>
    tpu.vector_store %arg5[%c40_47, %c364], %53 {strides = array<i32>} : memref<72x384xf32, #tpu.memory_space<vmem>>, vector<8x20xf32>,
    %c0_i32_48 = arith.constant 0 : i32
    %55 = arith.addi %arg1, %c0_i32_48 : i32
    %c0_49 = arith.constant 0 : index
    %56 = arith.index_cast %55 : i32 to index
    %c0_50 = arith.constant 0 : index
    %c36 = arith.constant 36 : index
    %57 = vector.load %arg2[%c0_49, %56, %c0_50, %c36] : memref<1x2x8x384xf32, #tpu.memory_space<vmem>>, vector<1x1x8x348xf32>
    %58 = vector.shape_cast %57 : vector<1x1x8x348xf32> to vector<8x348xf32>
    %c48 = arith.constant 48 : index
    %c0_51 = arith.constant 0 : index
    %59 = vector.load %arg5[%c48, %c0_51] : memref<72x384xf32, #tpu.memory_space<vmem>>, vector<8x348xf32>
    tpu.vector_store %arg5[%c48, %c0_51], %58 {strides = array<i32>} : memref<72x384xf32, #tpu.memory_space<vmem>>, vector<8x348xf32>,
    %c1_i32_52 = arith.constant 1 : i32
    %60 = arith.addi %arg1, %c1_i32_52 : i32
    %c0_53 = arith.constant 0 : index
    %61 = arith.index_cast %60 : i32 to index
    %c0_54 = arith.constant 0 : index
    %c0_55 = arith.constant 0 : index
    %62 = vector.load %arg2[%c0_53, %61, %c0_54, %c0_55] : memref<1x2x8x384xf32, #tpu.memory_space<vmem>>, vector<1x1x8x36xf32>
    %63 = vector.shape_cast %62 : vector<1x1x8x36xf32> to vector<8x36xf32>
    %c48_56 = arith.constant 48 : index
    %c348 = arith.constant 348 : index
    %64 = vector.load %arg5[%c48_56, %c348] : memref<72x384xf32, #tpu.memory_space<vmem>>, vector<8x36xf32>
    tpu.vector_store %arg5[%c48_56, %c348], %63 {strides = array<i32>} : memref<72x384xf32, #tpu.memory_space<vmem>>, vector<8x36xf32>,
    %c0_i32_57 = arith.constant 0 : i32
    %65 = arith.addi %arg1, %c0_i32_57 : i32
    %c0_58 = arith.constant 0 : index
    %66 = arith.index_cast %65 : i32 to index
    %c0_59 = arith.constant 0 : index
    %c37 = arith.constant 37 : index
    %67 = vector.load %arg2[%c0_58, %66, %c0_59, %c37] : memref<1x2x8x384xf32, #tpu.memory_space<vmem>>, vector<1x1x8x347xf32>
    %68 = vector.shape_cast %67 : vector<1x1x8x347xf32> to vector<8x347xf32>
    %c56 = arith.constant 56 : index
    %c0_60 = arith.constant 0 : index
    %69 = vector.load %arg5[%c56, %c0_60] : memref<72x384xf32, #tpu.memory_space<vmem>>, vector<8x347xf32>
    tpu.vector_store %arg5[%c56, %c0_60], %68 {strides = array<i32>} : memref<72x384xf32, #tpu.memory_space<vmem>>, vector<8x347xf32>,
    %c1_i32_61 = arith.constant 1 : i32
    %70 = arith.addi %arg1, %c1_i32_61 : i32
    %c0_62 = arith.constant 0 : index
    %71 = arith.index_cast %70 : i32 to index
    %c0_63 = arith.constant 0 : index
    %c0_64 = arith.constant 0 : index
    %72 = vector.load %arg2[%c0_62, %71, %c0_63, %c0_64] : memref<1x2x8x384xf32, #tpu.memory_space<vmem>>, vector<1x1x8x37xf32>
    %73 = vector.shape_cast %72 : vector<1x1x8x37xf32> to vector<8x37xf32>
    %c56_65 = arith.constant 56 : index
    %c347 = arith.constant 347 : index
    %74 = vector.load %arg5[%c56_65, %c347] : memref<72x384xf32, #tpu.memory_space<vmem>>, vector<8x37xf32>
    tpu.vector_store %arg5[%c56_65, %c347], %73 {strides = array<i32>} : memref<72x384xf32, #tpu.memory_space<vmem>>, vector<8x37xf32>,
    %c0_i32_66 = arith.constant 0 : i32
    %75 = arith.addi %arg1, %c0_i32_66 : i32
    %c0_67 = arith.constant 0 : index
    %76 = arith.index_cast %75 : i32 to index
    %c0_68 = arith.constant 0 : index
    %c38 = arith.constant 38 : index
    %77 = vector.load %arg2[%c0_67, %76, %c0_68, %c38] : memref<1x2x8x384xf32, #tpu.memory_space<vmem>>, vector<1x1x8x346xf32>
    %78 = vector.shape_cast %77 : vector<1x1x8x346xf32> to vector<8x346xf32>
    %c64 = arith.constant 64 : index
    %c0_69 = arith.constant 0 : index
    %79 = vector.load %arg5[%c64, %c0_69] : memref<72x384xf32, #tpu.memory_space<vmem>>, vector<8x346xf32>
    tpu.vector_store %arg5[%c64, %c0_69], %78 {strides = array<i32>} : memref<72x384xf32, #tpu.memory_space<vmem>>, vector<8x346xf32>,
    %c1_i32_70 = arith.constant 1 : i32
    %80 = arith.addi %arg1, %c1_i32_70 : i32
    %c0_71 = arith.constant 0 : index
    %81 = arith.index_cast %80 : i32 to index
    %c0_72 = arith.constant 0 : index
    %c0_73 = arith.constant 0 : index
    %82 = vector.load %arg2[%c0_71, %81, %c0_72, %c0_73] : memref<1x2x8x384xf32, #tpu.memory_space<vmem>>, vector<1x1x8x38xf32>
    %83 = vector.shape_cast %82 : vector<1x1x8x38xf32> to vector<8x38xf32>
    %c64_74 = arith.constant 64 : index
    %c346 = arith.constant 346 : index
    %84 = vector.load %arg5[%c64_74, %c346] : memref<72x384xf32, #tpu.memory_space<vmem>>, vector<8x38xf32>
    tpu.vector_store %arg5[%c64_74, %c346], %83 {strides = array<i32>} : memref<72x384xf32, #tpu.memory_space<vmem>>, vector<8x38xf32>,
    %c0_75 = arith.constant 0 : index
    %c0_76 = arith.constant 0 : index
    %85 = vector.load %arg3[%c0_75, %c0_76] : memref<6x72xf32, #tpu.memory_space<vmem>>, vector<6x72xf32>
    %c0_77 = arith.constant 0 : index
    %c0_78 = arith.constant 0 : index
    %86 = vector.load %arg5[%c0_77, %c0_78] : memref<72x384xf32, #tpu.memory_space<vmem>>, vector<72x384xf32>
    %cst = arith.constant dense<0.000000e+00> : vector<6x384xf32>
    %87 = tpu.matmul %85, %86, %cst {dimension_numbers = #tpu.dot_dimension_numbers<[1], [0], [0], [1], [0, 0, 1, 1], [], []>} : vector<6x72xf32>, vector<72x384xf32>, vector<6x384xf32> -> vector<6x384xf32>
    %c0_79 = arith.constant 0 : index
    %c0_80 = arith.constant 0 : index
    %c0_81 = arith.constant 0 : index
    %88 = vector.load %arg4[%c0_79, %c0_80, %c0_81] : memref<1x6x384xf32, #tpu.memory_space<vmem>>, vector<1x6x384xf32>
    %89 = vector.shape_cast %88 : vector<1x6x384xf32> to vector<6x384xf32>
    %90 = vector.shape_cast %87 : vector<6x384xf32> to vector<1x6x384xf32>
    tpu.vector_store %arg4[%c0_79, %c0_80, %c0_81], %90 {strides = array<i32>} : memref<1x6x384xf32, #tpu.memory_space<vmem>>, vector<1x6x384xf32>,
    return
  }
  func.func @transform_0(%arg0: i32, %arg1: i32) -> (i32, i32, i32, i32) {
    %c0_i32 = arith.constant 0 : i32
    %c0_i32_0 = arith.constant 0 : i32
    %c0_i32_1 = arith.constant 0 : i32
    %c0_i32_2 = arith.constant 0 : i32
    return %arg0, %c0_i32, %c0_i32_0, %c0_i32_1 : i32, i32, i32, i32
  }
  func.func @transform_1(%arg0: i32, %arg1: i32) -> (i32, i32) {
    %c0_i32 = arith.constant 0 : i32
    %c0_i32_0 = arith.constant 0 : i32
    %c0_i32_1 = arith.constant 0 : i32
    return %c0_i32, %c0_i32_0 : i32, i32
  }
  func.func @transform_2(%arg0: i32, %arg1: i32) -> (i32, i32, i32) {
    %c0_i32 = arith.constant 0 : i32
    %c0_i32_0 = arith.constant 0 : i32
    return %arg0, %c0_i32, %arg1 : i32, i32, i32
  }
}

</mosaic_0001>

<bundles_post_ra>
// kernel: _lambda_.1
= control target key start
LH: loop header
LB: loop body
LE: loop exit
PB: predicated region body
PF: predicated region fallthrough
CT: control target
= control target key end

     0   :  { %s686_s9 = smov 0   ;;  %s688_s10 = smov 0   ;;  %s791_s0 = inlined_call_operand.vmem [shape: f32[2,2,8,384], index: 0, kind: input, shape index: {}]   ;;  %s792_s1 = inlined_call_operand.vmem [shape: f32[6,72], index: 1, kind: input, shape index: {}]   ;;  %s793_s2 = inlined_call_operand.vmem [shape: f32[2,6,384], index: 2, kind: output, shape index: {}]  }
   0x1   :  { %s690_s11 = smov 0  }
   0x2 LB: > { %s24_s12 = sadd.s32 1, %s657_s10  ;;  %p589_p0 = scmp.ge.s32.totalorder %s661_s11, 1  ;;  %s661_s11 = sphi %s690_s11, %s12_s11   ;;  %s657_s10 = sphi %s688_s10, %s795_s10   ;;  %s653_s9 = sphi %s686_s9, %s794_s9  }
   0x3   : > { %p26_p1 = scmp.ge.s32.totalorder %s24_s12, 2  ;;  %p126_p2 = scmp.lt.s32.totalorder %s661_s11, 3 }
   0x5   : > { %s797_s12 = smov (%p26_p1, %s24_s12), 0  ;;  %p127_p3 = pnand %p589_p0, %p126_p2 }
   0x6   : > { %p152_p4 = scmp.lt.s32.totalorder (!%p127_p3), %s653_s9, 1  ;;  %s663_s17 = smov (!%p127_p3), 90  }
   0x7   : > { %130 = sbr.rel (%p127_p3) target bundleno = 344 (0x158), region = 28  ;;  %s664_s18 = smov (!%p127_p3), 91  }
   0x8   : > { %s665_s19 = smov (!%p127_p3), 92   ;;  %s666_s20 = smov (!%p127_p3), 108  }
   0x9   : > { %s667_s21 = smov (!%p127_p3), 109   ;;  %s668_s22 = smov (!%p127_p3), 110  }
   0xa   : > { %s669_s23 = smov (!%p127_p3), 126   ;;  %s670_s24 = smov (!%p127_p3), 127  }
   0xc   : > { %s799_s9 = smov (!%p152_p4, %s653_s9), 1  ;;  %vm332_vm0 = vcmask 752640   ;;  %vm346_vm1 = vcmask 1048288   ;;  %vm388_vm2 = vcmask 736256   ;;  %vm360_vm3 = vcmask 744448  }
   0xd   : > { %s605_s13 = smul.u32 48, %s799_s9  ;;  %vm402_vm4 = vcmask 1048272   ;;  %vm374_vm5 = vcmask 1048280   ;;  %vm248_vm6 = vcmask 900096   ;;  %vm304_vm7 = vcmask 883712  }
   0xe   : > { %vm262_vm8 = vcmask 1048432   ;;  %vm318_vm9 = vcmask 1048416   ;;  %vm276_vm10 = vcmask 891904   ;;  %vm290_vm11 = vcmask 1048424   ;;  %v404_v56 = vld [vmem:[%s792_s1] sm:$0x3f] }
   0xf   : > { %s156_s16 = scalar_lea.vmem %s791_s0, %s605_s13  ;;  %vm220_vm12 = vcmask 1031168   ;;  %vm234_vm13 = vcmask 1048560   ;;  %vm188_vm14 = vcmask 1039360   ;;  %vm206_vm15 = vcmask 1048568   ;;  %s606_s27 = smul.u32 24, %s799_s9 }
  0x10   : > { %v710_v0 = vld [vmem:[%s156_s16 + $0x10] sm:$0xff]  ;;  %v714_v1 = vld [vmem:[%s156_s16] sm:$0xff]  ;;  %v717_v2 = vld [vmem:[%s156_s16 + $0x8] sm:$0xff] }
  0x11   : > { %386 = vrot.lane.b32.xlu0 %v710_v0, %s663_s17  ;;  %358 = vrot.lane.b32.xlu1 %v710_v0, %s664_s18  ;;  %v599_v3 = vld [vmem:[%s156_s16 + $0x18] sm:$0xff]  ;;  %s165_s30 = scalar_lea.vmem %s793_s2, %s606_s27 }
  0x12   : > { %330 = vrot.lane.b32.xlu2 %v710_v0, %s665_s19 }
  0x19   : > { %399 = vrot.lane.b32.xlu0 %v599_v3, %s663_s17  ;;  %371 = vrot.lane.b32.xlu1 %v599_v3, %s664_s18 }
  0x1a   : > { %343 = vrot.lane.b32.xlu2 %v599_v3, %s665_s19 }
  0x21   : > { %382 = vrot.lane.b32.xlu1 %v714_v1, %s663_s17  ;;  %302 = vrot.lane.b32.xlu0 %v710_v0, %s666_s20 }
  0x22   : > { %384 = vrot.lane.b32.xlu2 %v717_v2, %s663_s17 }
  0x29   : > { %315 = vrot.lane.b32.xlu0 %v599_v3, %s666_s20  ;;  %274 = vrot.lane.b32.xlu1 %v710_v0, %s667_s21 }
  0x2a   : > { %354 = vrot.lane.b32.xlu2 %v714_v1, %s664_s18 }
  0x31   : > { %356 = vrot.lane.b32.xlu0 %v717_v2, %s664_s18  ;;  %287 = vrot.lane.b32.xlu1 %v599_v3, %s667_s21 }
  0x32   : > { %246 = vrot.lane.b32.xlu2 %v710_v0, %s668_s22 }
  0x39   : > { %326 = vrot.lane.b32.xlu0 %v714_v1, %s665_s19  ;;  %328 = vrot.lane.b32.xlu1 %v717_v2, %s665_s19 }
  0x3a   : > { %259 = vrot.lane.b32.xlu2 %v599_v3, %s668_s22 }
  0x41   : > { %298 = vrot.lane.b32.xlu1 %v714_v1, %s666_s20  ;;  %218 = vrot.lane.b32.xlu0 %v710_v0, %s669_s23 }
  0x42   : > { %300 = vrot.lane.b32.xlu2 %v717_v2, %s666_s20 }
  0x49   : > { %231 = vrot.lane.b32.xlu0 %v599_v3, %s669_s23  ;;  %186 = vrot.lane.b32.xlu1 %v710_v0, %s670_s24 }
  0x4a   : > { %270 = vrot.lane.b32.xlu2 %v714_v1, %s667_s21 }
  0x51   : > { %272 = vrot.lane.b32.xlu0 %v717_v2, %s667_s21  ;;  %203 = vrot.lane.b32.xlu1 %v599_v3, %s670_s24 }
  0x52   : > { %242 = vrot.lane.b32.xlu2 %v714_v1, %s668_s22 }
  0x59   : > { %244 = vrot.lane.b32.xlu0 %v717_v2, %s668_s22  ;;  %214 = vrot.lane.b32.xlu1 %v714_v1, %s669_s23 }
  0x5a   : > { %216 = vrot.lane.b32.xlu2 %v717_v2, %s669_s23 }
  0x61   : > { %184 = vrot.lane.b32.xlu1 %v717_v2, %s670_s24  ;;  %182 = vrot.lane.b32.xlu0 %v714_v1, %s670_s24 }
  0x6c   : > { %v740_v4 = vpop.permute.xlu2 %330 }
  0x6d   : > { %340 = vst.msk [vmem:[#allocation2 + $0xa0] sm:$0xff] %vm332_vm0, %v740_v4 }
  0x74   : > { %v344_v5 = vpop.permute.xlu2 %343 }
  0x75   : > { %347 = vst.msk [vmem:[#allocation2 + $0xa0] sm:$0xff] %vm346_vm1, %v344_v5 }
  0x7c   : > { %v385_v6 = vpop.permute.xlu2 %384  ;;  %v425_v20 = vld [vmem:[#allocation2 + $0xa0] sm:$0xff] }
  0x83   : > { %v387_v7 = vpop.permute.xlu0 %386  ;;  %v359_v8 = vpop.permute.xlu1 %358 }
  0x84   : > { %v390_v9 = vsel %vm388_vm2, %v385_v6, %v387_v7  ;;  %396 = vst.msk [vmem:[#allocation2 + $0xd0] sm:$0xff] %vm388_vm2, %v387_v7  ;;  %v355_v10 = vpop.permute.xlu2 %354 }
  0x85   : > { %463 = vmatpush.msra.mxu1 %v390_v9  ;;  %368 = vst.msk [vmem:[#allocation2 + $0xb8] sm:$0xff] %vm360_vm3, %v359_v8 }
  0x8b   : > { %v400_v11 = vpop.permute.xlu0 %399  ;;  %v372_v12 = vpop.permute.xlu1 %371 }
  0x8c   : > { %403 = vst.msk [vmem:[#allocation2 + $0xd0] sm:$0xff] %vm402_vm4, %v400_v11  ;;  %v747_v13 = vpop.permute.xlu2 %246 }
  0x8d   : > { %375 = vst.msk [vmem:[#allocation2 + $0xb8] sm:$0xff] %vm374_vm5, %v372_v12 }
  0x8e   : > { %256 = vst.msk [vmem:[#allocation2 + $0x58] sm:$0xff] %vm248_vm6, %v747_v13 }
  0x93   : > { %v383_v14 = vpop.permute.xlu1 %382  ;;  %v303_v15 = vpop.permute.xlu0 %302  ;;  %v431_v16 = vld [vmem:[#allocation2 + $0xd0] sm:$0xff] }
  0x94   : > { %v389_v17 = vsel %vm388_vm2, %v383_v14, %v385_v6  ;;  %312 = vst.msk [vmem:[#allocation2 + $0x88] sm:$0xff] %vm304_vm7, %v303_v15  ;;  %v260_v18 = vpop.permute.xlu2 %259  ;;  %483 = vmatpush.msra.mxu2 %v431_v16  ;;  %v428_v19 = vld [vmem:[#allocation2 + $0xb8] sm:$0xff] }
  0x95   : > { %443 = vmatpush.msra.mxu0 %v389_v17  ;;  %263 = vst.msk [vmem:[#allocation2 + $0x58] sm:$0xff] %vm262_vm8, %v260_v18 }
  0x96   : > { %484 = vmatpush.msra.mxu2 %v428_v19 }
  0x98   : > { %485 = vmatpush.msra.mxu2 %v425_v20 }
  0x9b   : > { %v316_v21 = vpop.permute.xlu0 %315  ;;  %v275_v22 = vpop.permute.xlu1 %274 }
  0x9c   : > { %319 = vst.msk [vmem:[#allocation2 + $0x88] sm:$0xff] %vm318_vm9, %v316_v21  ;;  %v301_v23 = vpop.permute.xlu2 %300  ;;  %v416_v34 = vld [vmem:[#allocation2 + $0x58] sm:$0xff] }
  0x9d   : > { %284 = vst.msk [vmem:[#allocation2 + $0x70] sm:$0xff] %vm276_vm10, %v275_v22  ;;  %v306_v24 = vsel %vm304_vm7, %v301_v23, %v303_v15 }
  0xa3   : > { %v357_v25 = vpop.permute.xlu0 %356  ;;  %v288_v26 = vpop.permute.xlu1 %287  ;;  %v422_v27 = vld [vmem:[#allocation2 + $0x88] sm:$0xff] }
  0xa4   : > { %v361_v28 = vsel %vm360_vm3, %v355_v10, %v357_v25  ;;  %v362_v29 = vsel %vm360_vm3, %v357_v25, %v359_v8  ;;  %291 = vst.msk [vmem:[#allocation2 + $0x70] sm:$0xff] %vm290_vm11, %v288_v26  ;;  %v271_v30 = vpop.permute.xlu2 %270  ;;  %486 = vmatpush.msra.mxu2 %v422_v27 }
  0xa5   : > { %444 = vmatpush.msra.mxu0 %v361_v28  ;;  %464 = vmatpush.msra.mxu1 %v362_v29 }
  0xab   : > { %v327_v31 = vpop.permute.xlu0 %326  ;;  %v329_v32 = vpop.permute.xlu1 %328  ;;  %v419_v33 = vld [vmem:[#allocation2 + $0x70] sm:$0xff] }
  0xac   : > { %v333_v35 = vsel %vm332_vm0, %v327_v31, %v329_v32  ;;  %v334_v36 = vsel %vm332_vm0, %v329_v32, %v740_v4  ;;  %v243_v37 = vpop.permute.xlu2 %242  ;;  %487 = vmatpush.msra.mxu2 %v419_v33  ;;  %vm432_vm0 = vcmask 588800  }
  0xad   : > { %445 = vmatpush.msra.mxu0 %v333_v35  ;;  %465 = vmatpush.msra.mxu1 %v334_v36 }
  0xae   : > { %488 = vmatpush.msra.mxu2 %v416_v34 }
  0xaf   : > { %466 = vmatpush.msra.mxu1 %v306_v24 }
  0xb3   : > { %v299_v38 = vpop.permute.xlu1 %298  ;;  %v219_v39 = vpop.permute.xlu0 %218 }
  0xb4   : > { %v305_v40 = vsel %vm304_vm7, %v299_v38, %v301_v23  ;;  %228 = vst.msk [vmem:[#allocation2 + $0x40] sm:$0xff] %vm220_vm12, %v219_v39  ;;  %v217_v41 = vpop.permute.xlu2 %216 }
  0xb5   : > { %v222_v42 = vsel %vm220_vm12, %v217_v41, %v219_v39  ;;  %446 = vmatpush.msra.mxu0 %v305_v40 }
  0xbb   : > { %v232_v43 = vpop.permute.xlu0 %231  ;;  %v187_v44 = vpop.permute.xlu1 %186 }
  0xbc   : > { %235 = vst.msk [vmem:[#allocation2 + $0x40] sm:$0xff] %vm234_vm13, %v232_v43 }
  0xbd   : > { %196 = vst.msk [vmem:[#allocation2 + $0x28] sm:$0xff] %vm188_vm14, %v187_v44 }
  0xc3   : > { %v273_v45 = vpop.permute.xlu0 %272  ;;  %v204_v46 = vpop.permute.xlu1 %203  ;;  %v413_v47 = vld [vmem:[#allocation2 + $0x40] sm:$0xff] }
  0xc4   : > { %v277_v48 = vsel %vm276_vm10, %v271_v30, %v273_v45  ;;  %v278_v49 = vsel %vm276_vm10, %v273_v45, %v275_v22  ;;  %207 = vst.msk [vmem:[#allocation2 + $0x28] sm:$0xff] %vm206_vm15, %v204_v46  ;;  %489 = vmatpush.msra.mxu2 %v413_v47 }
  0xc5   : > { %447 = vmatpush.msra.mxu0 %v277_v48  ;;  %467 = vmatpush.msra.mxu1 %v278_v49 }
  0xcb   : > { %v245_v50 = vpop.permute.xlu0 %244  ;;  %v215_v51 = vpop.permute.xlu1 %214  ;;  %v410_v52 = vld [vmem:[#allocation2 + $0x28] sm:$0xff] }
  0xcc   : > { %v249_v53 = vsel %vm248_vm6, %v243_v37, %v245_v50  ;;  %v250_v54 = vsel %vm248_vm6, %v245_v50, %v747_v13  ;;  %v221_v55 = vsel %vm220_vm12, %v215_v51, %v217_v41  ;;  %490 = vmatpush.msra.mxu2 %v410_v52 }
  0xcd   : > { %448 = vmatpush.msra.mxu0 %v249_v53  ;;  %468 = vmatpush.msra.mxu1 %v250_v54 }
  0xce   : > { %491 = vmatpush.msra.mxu2 %v710_v0 }
  0xcf   : > { %449 = vmatpush.msra.mxu0 %v221_v55  ;;  %469 = vmatpush.msra.mxu1 %v222_v42 }
  0xd0   : > { %602 = vmatmul.msk.f32.vlgmr.msra.gmra.mxu2 %vm432_vm0, %v404_v56 }
  0xd3   : > { %v185_v57 = vpop.permute.xlu1 %184  ;;  %v183_v58 = vpop.permute.xlu0 %182 }
  0xd4   : > { %v190_v59 = vsel %vm188_vm14, %v185_v57, %v187_v44  ;;  %v189_v60 = vsel %vm188_vm14, %v183_v58, %v185_v57 }
  0xd5   : > { %450 = vmatpush.msra.mxu0 %v189_v60  ;;  %470 = vmatpush.msra.mxu1 %v190_v59 }
  0xd7   : > { %451 = vmatpush.msra.mxu0 %v714_v1  ;;  %471 = vmatpush.msra.mxu1 %v717_v2 }
  0xd8   : > { %600 = vmatmul.msk.f32.vlgmr.msra.gmra.mxu0 %vm432_vm0, %v404_v56  ;;  %601 = vmatmul.msk.f32.vlgmr.msra.gmra.mxu1 %vm432_vm0, %v404_v56 }
 0x153   : > { %v493_v61 = vpop.f32.mrf.mxu2 }
 0x154   : > { %498 = vst [vmem:[%s165_s30 + $0x10] sm:$0x3f] %v493_v61 }
 0x155   : > { %v453_v62 = vpop.f32.mrf.mxu0  ;;  %v473_v63 = vpop.f32.mrf.mxu1 }
 0x156   : > { %496 = vst [vmem:[%s165_s30] sm:$0x3f] %v453_v62 }
 0x157   : > { %497 = vst [vmem:[%s165_s30 + $0x8] sm:$0x3f] %v473_v63 }
 0x158 PF: > { %s12_s11 = sadd.s32 1, %s661_s11   ;;  %s794_s9 = smov %s657_s10 }
 0x159   : > { %p9_p5 = scmp.ge.s32.totalorder %s12_s11, 4   ;;  %s795_s10 = smov %s797_s12 }
 0x15b   :  { %11 = sbr.rel (!%p9_p5) target bundleno = 2 (0x2), region = 60 }

</bundles_post_ra>
